<compile_context>
chip_gen: v7x
topology: tpu7x:2x2x1
jax: 0.10.0
libtpu: 0.0.40
codegen_flags: <defaults>
</compile_context>

<pallas_src>
import jax
import jax.numpy as jnp
from jax.experimental import pallas as pl
from jax.experimental.pallas import tpu as pltpu


def _round_up(n, m):
    return ((n + m - 1) // m) * m


def actor_critic_kernel(x_ref, w1_ref, b1_ref, wh_ref, bh_ref, out_ref):
    # Trunk: h = tanh(x @ W1 + b1) — bf16 MXU operands, f32 accumulation,
    # bias-add/tanh in f32.
    x = x_ref[...].astype(w1_ref.dtype)
    h = jnp.tanh(
        jnp.dot(x, w1_ref[...], preferred_element_type=jnp.float32)
        + b1_ref[...]
    )
    # Fused heads: [policy | value | zero-pad] = h @ Wh + bh (lane-dense out).
    out_ref[...] = (
        jnp.dot(h.astype(wh_ref.dtype), wh_ref[...],
                preferred_element_type=jnp.float32)
        + bh_ref[...]
    ).astype(out_ref.dtype)


def fuse_head_params(params, *, compute_dtype=jnp.bfloat16):
    """One-time param prep: pad hidden dim to a multiple of 128, fuse the
    policy/value heads into a single lane-dense [Hp, pad128(A+1)] matmul, and
    store the weights in bf16 (biases stay f32)."""
    w1, b1 = params["w1"], params["b1"]          # [S, H], [1, H]
    wp, bp = params["wp"], params["bp"]          # [H, A], [1, A]
    wv, bv = params["wv"], params["bv"]          # [H, 1], [1, 1]

    S, H = w1.shape
    Hp = _round_up(H, 128)
    if Hp != H:
        # Zero-padded hidden columns: tanh(0 + 0) = 0 and the matching Wh rows
        # are zero, so they contribute nothing to the heads.
        w1 = jnp.pad(w1, ((0, 0), (0, Hp - H)))
        b1 = jnp.pad(b1, ((0, 0), (0, Hp - H)))

    w_head = jnp.concatenate([wp, wv], axis=1)   # [H, A+1]
    b_head = jnp.concatenate([bp, bv], axis=1)   # [1, A+1]
    W = w_head.shape[1]
    Wp = _round_up(W, 128)
    w_head = jnp.pad(w_head, ((0, Hp - H), (0, Wp - W)))
    b_head = jnp.pad(b_head, ((0, 0), (0, Wp - W)))

    return {
        "w1": w1.astype(compute_dtype),
        "b1": b1.astype(jnp.float32),
        "w_head": w_head.astype(compute_dtype),
        "b_head": b_head.astype(jnp.float32),
    }


def actor_critic_forward(x, fused_params, action_size, *, block_b=None):
    """x: [B, state_size] float32.  fused_params: output of fuse_head_params.

    Returns (policy_logits [B, action_size], value [B, 1]), float32."""
    w1, b1 = fused_params["w1"], fused_params["b1"]
    wh, bh = fused_params["w_head"], fused_params["b_head"]

    B, S = x.shape
    H = w1.shape[1]             # padded hidden width (multiple of 128)
    Hp = wh.shape[1]            # lane-dense fused-head width (multiple of 128)

    # ---- batch tile selection (no wrapper-side padding / extra HBM copy) ---
    if block_b is None:
        if B <= 16:
            block_b = B                              # one full-extent block
        else:
            # >= 2 grid steps so the "parallel" axis can shard across both
            # v7x TensorCores; cap at 1024 rows (fat tiles amortize the
            # ~0.35us per-step overhead while staying VMEM-friendly).
            block_b = min(1024, _round_up(pl.cdiv(B, 2), 8))
    else:
        block_b = _round_up(max(block_b, 8), 8)
    if block_b >= B:
        block_b = B                                  # full-extent block: legal
    grid = (pl.cdiv(B, block_b),)                    # ragged last tile is fine

    # ---- explicit VMEM budget (v5e default scoped limit is only 16 MiB;
    #      v7x physical VMEM is 64 MiB, so cap there) ------------------------
    wbytes = (w1.size * w1.dtype.itemsize + wh.size * wh.dtype.itemsize
              + b1.size * b1.dtype.itemsize + bh.size * bh.dtype.itemsize)
    x_tile = block_b * S * x.dtype.itemsize
    out_tile = block_b * Hp * 4
    est = 2 * (x_tile + out_tile) + 2 * wbytes + (4 << 20)
    vmem_limit = int(min(64 << 20, max(32 << 20, est)))

    out = pl.pallas_call(
        actor_critic_kernel,
        out_shape=jax.ShapeDtypeStruct((B, Hp), jnp.float32),
        grid_spec=pltpu.PrefetchScalarGridSpec(
            num_scalar_prefetch=0,
            grid=grid,
            in_specs=[
                pl.BlockSpec((block_b, S), lambda i: (i, 0)),   # x: batch-tiled
                pl.BlockSpec((S, H), lambda i: (0, 0)),         # W1 (bf16, resident)
                pl.BlockSpec((1, H), lambda i: (0, 0)),         # b1 (f32, resident)
                pl.BlockSpec((H, Hp), lambda i: (0, 0)),        # fused head W (bf16)
                pl.BlockSpec((1, Hp), lambda i: (0, 0)),        # fused head b (f32)
            ],
            out_specs=pl.BlockSpec((block_b, Hp), lambda i: (i, 0)),
        ),
        compiler_params=pltpu.CompilerParams(
            dimension_semantics=("parallel",),
            vmem_limit_bytes=vmem_limit,
        ),
    )(x, w1, b1, wh, bh)

    policy_logits = out[:, :action_size]
    value = out[:, action_size:action_size + 1]      # keep [B, 1] (PyTorch contract)
    return policy_logits, value


def init_params(key, state_size, action_size, hidden_size):
    """Deterministic synthetic init (shapes match nn.Linear in the module)."""
    k1, k2, k3, k4, k5, k6 = jax.random.split(key, 6)
    scale1 = 1.0 / jnp.sqrt(state_size)
    scale2 = 1.0 / jnp.sqrt(hidden_size)
    return {
        "w1": jax.random.uniform(k1, (state_size, hidden_size), jnp.float32,
                                 -scale1, scale1),
        "b1": jax.random.uniform(k2, (1, hidden_size), jnp.float32,
                                 -scale1, scale1),
        "wp": jax.random.uniform(k3, (hidden_size, action_size), jnp.float32,
                                 -scale2, scale2),
        "bp": jax.random.uniform(k4, (1, action_size), jnp.float32,
                                 -scale2, scale2),
        "wv": jax.random.uniform(k5, (hidden_size, 1), jnp.float32,
                                 -scale2, scale2),
        "bv": jax.random.uniform(k6, (1, 1), jnp.float32, -scale2, scale2),
    }


def _reference(x, params):
    h = jnp.tanh(x @ params["w1"] + params["b1"])
    return h @ params["wp"] + params["bp"], h @ params["wv"] + params["bv"]


if __name__ == "__main__":
    key = jax.random.PRNGKey(0)
    kx, kp = jax.random.split(key)

    batch = 2
    state_size = 8
    action_size = 4
    hidden_size = 32

    x = jax.random.normal(kx, (batch, state_size), jnp.float32)
    params = init_params(kp, state_size, action_size, hidden_size)
    fused = fuse_head_params(params)

    policy_logits, value = actor_critic_forward(x, fused, action_size)
    jax.block_until_ready((policy_logits, value))

    # Pure-JAX f32 reference (unfused params). Tolerance loosened for bf16
    # matmul operands.
    policy_ref, value_ref = _reference(x, params)
    assert policy_logits.shape == (batch, action_size)
    assert value.shape == (batch, 1)
    assert jnp.allclose(policy_logits, policy_ref, atol=3e-2, rtol=3e-2)
    assert jnp.allclose(value, value_ref, atol=3e-2, rtol=3e-2)

    # Second check: non-divisible batch -> multi-step grid with a ragged last
    # tile (exercises the no-padding path).
    x2 = jax.random.normal(jax.random.PRNGKey(1), (50, state_size), jnp.float32)
    p2, v2 = actor_critic_forward(x2, fused, action_size)
    jax.block_until_ready((p2, v2))
    p2_ref, v2_ref = _reference(x2, params)
    assert p2.shape == (50, action_size) and v2.shape == (50, 1)
    assert jnp.allclose(p2, p2_ref, atol=3e-2, rtol=3e-2)
    assert jnp.allclose(v2, v2_ref, atol=3e-2, rtol=3e-2)

    print("KERNEL_OK")
</pallas_src>

<mosaic_0001>
module attributes {stable_mosaic.version = 11 : i64} {
  func.func @actor_critic_kernel(%arg0: i32, %arg1: memref<2x8xf32, #tpu.memory_space<vmem>>, %arg2: memref<8x128xbf16, #tpu.memory_space<vmem>>, %arg3: memref<1x128xf32, #tpu.memory_space<vmem>>, %arg4: memref<128x128xbf16, #tpu.memory_space<vmem>>, %arg5: memref<1x128xf32, #tpu.memory_space<vmem>>, %arg6: memref<2x128xf32, #tpu.memory_space<vmem>>) attributes {dimension_semantics = [#tpu.dimension_semantics<parallel>], iteration_bounds = array<i64: 1>, scalar_prefetch = 0 : i64, scratch_operands = 0 : i64, tpu.core_type = #tpu.core_type<tc>, window_params = [{transform_indices = @transform_0, window_bounds = array<i64: 2, 8>}, {pipeline_mode = #tpu.pipeline_mode<synchronous>, transform_indices = @transform_1, window_bounds = array<i64: 8, 128>}, {pipeline_mode = #tpu.pipeline_mode<synchronous>, transform_indices = @transform_2, window_bounds = array<i64: 1, 128>}, {pipeline_mode = #tpu.pipeline_mode<synchronous>, transform_indices = @transform_3, window_bounds = array<i64: 128, 128>}, {pipeline_mode = #tpu.pipeline_mode<synchronous>, transform_indices = @transform_4, window_bounds = array<i64: 1, 128>}, {transform_indices = @transform_5, window_bounds = array<i64: 2, 128>}]} {
    %c0 = arith.constant 0 : index
    %c0_0 = arith.constant 0 : index
    %0 = vector.load %arg1[%c0, %c0_0] : memref<2x8xf32, #tpu.memory_space<vmem>>, vector<2x8xf32>
    %1 = arith.truncf %0 : vector<2x8xf32> to vector<2x8xbf16>
    %c0_1 = arith.constant 0 : index
    %c0_2 = arith.constant 0 : index
    %2 = vector.load %arg2[%c0_1, %c0_2] : memref<8x128xbf16, #tpu.memory_space<vmem>>, vector<8x128xbf16>
    %cst = arith.constant dense<0.000000e+00> : vector<2x128xf32>
    %3 = tpu.matmul %1, %2, %cst {dimension_numbers = #tpu.dot_dimension_numbers<[1], [0], [0], [1], [0, 0, 1, 1], [], []>} : vector<2x8xbf16>, vector<8x128xbf16>, vector<2x128xf32> -> vector<2x128xf32>
    %c0_3 = arith.constant 0 : index
    %c0_4 = arith.constant 0 : index
    %4 = vector.load %arg3[%c0_3, %c0_4] : memref<1x128xf32, #tpu.memory_space<vmem>>, vector<1x128xf32>
    %5 = vector.broadcast %4 : vector<1x128xf32> to vector<2x128xf32>
    %6 = arith.addf %3, %5 : vector<2x128xf32>
    %7 = math.tanh %6 : vector<2x128xf32>
    %8 = arith.truncf %7 : vector<2x128xf32> to vector<2x128xbf16>
    %c0_5 = arith.constant 0 : index
    %c0_6 = arith.constant 0 : index
    %9 = vector.load %arg4[%c0_5, %c0_6] : memref<128x128xbf16, #tpu.memory_space<vmem>>, vector<128x128xbf16>
    %cst_7 = arith.constant dense<0.000000e+00> : vector<2x128xf32>
    %10 = tpu.matmul %8, %9, %cst_7 {dimension_numbers = #tpu.dot_dimension_numbers<[1], [0], [0], [1], [0, 0, 1, 1], [], []>} : vector<2x128xbf16>, vector<128x128xbf16>, vector<2x128xf32> -> vector<2x128xf32>
    %c0_8 = arith.constant 0 : index
    %c0_9 = arith.constant 0 : index
    %11 = vector.load %arg5[%c0_8, %c0_9] : memref<1x128xf32, #tpu.memory_space<vmem>>, vector<1x128xf32>
    %12 = vector.broadcast %11 : vector<1x128xf32> to vector<2x128xf32>
    %13 = arith.addf %10, %12 : vector<2x128xf32>
    %c0_10 = arith.constant 0 : index
    %c0_11 = arith.constant 0 : index
    %14 = vector.load %arg6[%c0_10, %c0_11] : memref<2x128xf32, #tpu.memory_space<vmem>>, vector<2x128xf32>
    tpu.vector_store %arg6[%c0_10, %c0_11], %13 {strides = array<i32>} : memref<2x128xf32, #tpu.memory_space<vmem>>, vector<2x128xf32>,
    return
  }
  func.func @transform_0(%arg0: i32) -> (i32, i32) {
    %c0_i32 = arith.constant 0 : i32
    %c0_i32_0 = arith.constant 0 : i32
    return %arg0, %c0_i32 : i32, i32
  }
  func.func @transform_1(%arg0: i32) -> (i32, i32) {
    %c0_i32 = arith.constant 0 : i32
    %c0_i32_0 = arith.constant 0 : i32
    %c0_i32_1 = arith.constant 0 : i32
    return %c0_i32, %c0_i32_0 : i32, i32
  }
  func.func @transform_2(%arg0: i32) -> (i32, i32) {
    %c0_i32 = arith.constant 0 : i32
    %c0_i32_0 = arith.constant 0 : i32
    %c0_i32_1 = arith.constant 0 : i32
    return %c0_i32, %c0_i32_0 : i32, i32
  }
  func.func @transform_3(%arg0: i32) -> (i32, i32) {
    %c0_i32 = arith.constant 0 : i32
    %c0_i32_0 = arith.constant 0 : i32
    %c0_i32_1 = arith.constant 0 : i32
    return %c0_i32, %c0_i32_0 : i32, i32
  }
  func.func @transform_4(%arg0: i32) -> (i32, i32) {
    %c0_i32 = arith.constant 0 : i32
    %c0_i32_0 = arith.constant 0 : i32
    %c0_i32_1 = arith.constant 0 : i32
    return %c0_i32, %c0_i32_0 : i32, i32
  }
  func.func @transform_5(%arg0: i32) -> (i32, i32) {
    %c0_i32 = arith.constant 0 : i32
    %c0_i32_0 = arith.constant 0 : i32
    return %arg0, %c0_i32 : i32, i32
  }
}

</mosaic_0001>

<bundles_post_ra>
// kernel: tpu_custom_call.1
= control target key start
LH: loop header
LB: loop body
LE: loop exit
PB: predicated region body
PF: predicated region fallthrough
CT: control target
= control target key end

     0   :  { %10 = vsyncpa [#allocation3], 0  ;;  %s499_s0 = inlined_call_operand.hbm [shape: f32[2,8], index: 0, kind: input, shape index: {}]   ;;  %s500_s1 = inlined_call_operand.hbm [shape: bf16[8,128], index: 1, kind: input, shape index: {}]   ;;  %s501_s2 = inlined_call_operand.vmem [shape: f32[1,128], index: 2, kind: input, shape index: {}]   ;;  %s502_s3 = inlined_call_operand.hbm [shape: bf16[128,128], index: 3, kind: input, shape index: {}]   ;;  %s503_s4 = inlined_call_operand.vmem [shape: f32[1,128], index: 4, kind: input, shape index: {}]   ;;  %s504_s5 = inlined_call_operand.hbm [shape: f32[2,128], index: 5, kind: output, shape index: {}]  }
   0x1   :  { %11 = vsyncpa [#allocation6], 0 }
   0x2   :  { %12 = vsyncpa [#allocation4], 0  ;;  %s407_s18 = smov [#allocation5]   ;;  %s408_s20 = smov [#allocation2]  }
   0x3   :  { %s29_s19 = sshll.u32 %s407_s18, 4  ;;  %s19_s21 = sshll.u32 %s408_s20, 4  ;;  %s30_s19 = int_to_ptr.vmem [resolvable:$true] %s29_s19  ;;  %s20_s21 = int_to_ptr.vmem [resolvable:$true] %s19_s21 }
   0x4   :  { %s313_s24 = scalar_lea.hbm %s500_s1, 64 }
   0x5   :  { %p314_p0 = scmp.ne.s32.totalorder %s500_s1, %s313_s24  ;;  %p317_p1 = scmp.lt.u32.totalorder %s313_s24, %s500_s1 }
   0x7   :  { %p319_p2 = pnand %p317_p1, %p314_p0 }
   0x9   :  { %322 = shalt.err (!%p319_p2)
}
   0xa   :  { %s323_s29 = scalar_lea.vmem %s30_s19, 64  ;;  %p328_p4 = scmp.lt.s32.totalorder %s30_s19, %s30_s19 }
   0xb   :  { %p324_p3 = scmp.ne.s32.totalorder %s30_s19, %s323_s29  ;;  %p329_p5 = scmp.lt.s32.totalorder %s323_s29, %s323_s29 }
   0xd   :  { %p330_p6 = por %p329_p5, %p328_p4 }
   0xf   :  { %p331_p7 = pnand %p330_p6, %p324_p3 }
  0x11   :  { %334 = shalt.err (!%p331_p7)
}
  0x12   :  { %32 = dma.hbm_to_vmem [thread:$0]  %s500_s1, 64, %s30_s19, [#allocation6]  }
  0x13   :  { %s335_s9 = scalar_lea.hbm %s499_s0, 32 }
  0x14   :  { %p336_p8 = scmp.ne.s32.totalorder %s499_s0, %s335_s9  ;;  %p339_p9 = scmp.lt.u32.totalorder %s335_s9, %s499_s0 }
  0x16   :  { %p341_p10 = pnand %p339_p9, %p336_p8 }
  0x18   :  { %344 = shalt.err (!%p341_p10)
}
  0x19   :  { %s345_s14 = scalar_lea.vmem %s20_s21, 32  ;;  %p350_p12 = scmp.lt.s32.totalorder %s20_s21, %s20_s21 }
  0x1a   :  { %p346_p11 = scmp.ne.s32.totalorder %s20_s21, %s345_s14  ;;  %p351_p13 = scmp.lt.s32.totalorder %s345_s14, %s345_s14 }
  0x1c   :  { %p352_p0 = por %p351_p13, %p350_p12 }
  0x1e   :  { %p353_p1 = pnand %p352_p0, %p346_p11 }
  0x20   :  { %356 = shalt.err (!%p353_p1)
}
  0x21   :  { %22 = dma.hbm_to_vmem [thread:$0]  %s499_s0, 32, %s20_s21, [#allocation3]  }
  0x22   :  { %s409_s16 = smov [#allocation7]   ;;  %s357_s20 = scalar_lea.hbm %s502_s3, 1024 }
  0x23   :  { %s40_s17 = sshll.u32 %s409_s16, 4  ;;  %p358_p2 = scmp.ne.s32.totalorder %s502_s3, %s357_s20  ;;  %s41_s17 = int_to_ptr.vmem [resolvable:$true] %s40_s17 }
  0x24   :  { %p361_p3 = scmp.lt.u32.totalorder %s357_s20, %s502_s3 }
  0x26   :  { %p363_p4 = pnand %p361_p3, %p358_p2 }
  0x28   :  { %366 = shalt.err (!%p363_p4)
}
  0x29   :  { %s367_s26 = scalar_lea.vmem %s41_s17, 1024  ;;  %p372_p6 = scmp.lt.s32.totalorder %s41_s17, %s41_s17 }
  0x2a   :  { %p368_p5 = scmp.ne.s32.totalorder %s41_s17, %s367_s26  ;;  %p373_p7 = scmp.lt.s32.totalorder %s367_s26, %s367_s26 }
  0x2c   :  { %p374_p8 = por %p373_p7, %p372_p6 }
  0x2e   :  { %p375_p9 = pnand %p374_p8, %p368_p5 }
  0x30   :  { %378 = shalt.err (!%p375_p9)
}
  0x31   :  { %s410_s0 = smov 64   ;;  %s411_s21 = smov 4  }
  0x32   :  { %46 = dma.hbm_to_vmem [thread:$0]  %s502_s3, 1024, %s41_s17, [#allocation6], %s410_s0, %s410_s0, %s411_s21  }
  0x33   :  { %401 = dma.done.wait [#allocation3], 32  }
  0x34   :  { %402 = vsyncadd [#allocation3], 4294967264 }
  0x35   :  { %403 = dma.done.wait [#allocation6], 1088  }
  0x36   :  { %404 = vsyncadd [#allocation6], 4294966208  ;;  %v412_v0 = vmov 0.0   ;;  %vm413_vm0 = vmmov 0   ;;  %vm73_vm1 = vcmask 1043456   ;;  %v303_v5 = vld [vmem:[#allocation7] sm:$0xff]  }
  0x37   :  { %269 = vmatprep.subr.bf16.mxu0 %v412_v0  ;;  %271 = vmatprep.mubr.msk.bf16.mxu0 %vm413_vm0, %v412_v0  ;;  %v61_v1 = vld [vmem:[#allocation5] sm:$0xf]  ;;  %v59_v2 = vld [vmem:[#allocation2] sm:$0x3]  ;;  %vm69_vm2 = vcmask 64512   ;;  %v304_v6 = vld [vmem:[#allocation7 + $0x8] sm:$0xff]  }
  0x38   :  { %275 = vmatprep.subr.bf16.mxu1 %v412_v0  ;;  %291 = vmatprep.mubr.msk.bf16.mxu1 %vm413_vm0, %v412_v0  ;;  %v75_v3 = vsel %vm73_vm1, %v61_v1, 0  ;;  %v60_v4 = vpack.c.bf16 %v59_v2, %v59_v2  ;;  %v305_v7 = vld [vmem:[#allocation7 + $0x10] sm:$0xff]   ;;  %v306_v8 = vld [vmem:[#allocation7 + $0x18] sm:$0xff]   ;;  %v307_v9 = vld [vmem:[#allocation7 + $0x20] sm:$0xff]   ;;  %s414_s7 = smov [#allocation8]  }
  0x39   :  { %270 = vmatpush3.bf16.msra.mxu0 %v75_v3  ;;  %276 = vmatpush3.bf16.msra.mxu1 %v303_v5  ;;  %v308_v10 = vld [vmem:[#allocation7 + $0x28] sm:$0xff]   ;;  %v309_v11 = vld [vmem:[#allocation7 + $0x30] sm:$0xff]   ;;  %v310_v12 = vld [vmem:[#allocation7 + $0x38] sm:$0xff]   ;;  %s237_s8 = sshll.u32 %s414_s7, 4  ;;  %s238_s8 = int_to_ptr.vmem [resolvable:$true] %s237_s8 }
  0x3a   :  { %277 = vmatprep.subr.bf16.mxu1 %v412_v0  ;;  %v247_v13 = vld [vmem:[%s501_s2] ss:$0 sm:$0xff]  ;;  %s379_s2 = scalar_lea.vmem %s238_s8, 32  ;;  %p384_p11 = scmp.lt.s32.totalorder %s238_s8, %s238_s8 }
  0x3b   :  { %v249_v21 = vld [vmem:[%s503_s4] ss:$0 sm:$0xff]  ;;  %p380_p10 = scmp.ne.s32.totalorder %s238_s8, %s379_s2  ;;  %p385_p12 = scmp.lt.s32.totalorder %s379_s2, %s379_s2 }
  0x3c   :  { %272 = vmatmul.mubr.msk.bf16.vlgmr.msra.gmra.mrb[0].mxu0 %vm69_vm2, %v60_v4 }
  0x3d   :  { %278 = vmatpush3.bf16.msra.mxu1 %v304_v6  ;;  %p386_p13 = por %p385_p12, %p384_p11 }
  0x3e   :  { %279 = vmatprep.subr.bf16.mxu1 %v412_v0 }
  0x3f   :  { %p387_p0 = pnand %p386_p13, %p380_p10 }
  0x41   :  { %280 = vmatpush3.bf16.msra.mxu1 %v305_v7 }
  0x42   :  { %281 = vmatprep.subr.bf16.mxu1 %v412_v0 }
  0x45   :  { %282 = vmatpush3.bf16.msra.mxu1 %v306_v8 }
  0x46   :  { %283 = vmatprep.subr.bf16.mxu1 %v412_v0 }
  0x49   :  { %284 = vmatpush3.bf16.msra.mxu1 %v307_v9 }
  0x4a   :  { %285 = vmatprep.subr.bf16.mxu1 %v412_v0 }
  0x4d   :  { %286 = vmatpush3.bf16.msra.mxu1 %v308_v10 }
  0x4e   :  { %287 = vmatprep.subr.bf16.mxu1 %v412_v0 }
  0x51   :  { %288 = vmatpush3.bf16.msra.mxu1 %v309_v11 }
  0x52   :  { %289 = vmatprep.subr.bf16.mxu1 %v412_v0 }
  0x55   :  { %290 = vmatpush3.bf16.msra.mxu1 %v310_v12 }
 0x10f   :  { %v111_v14 = vpop.f32.mrb[0].mxu0 }
 0x110   :  { %v112_v15 = vadd.f32 %v247_v13, %v111_v14  ;;  %v273_v16 = vpop.f32.mrb[1].mxu0 }
 0x111   :  { %v114_v17 = vpop.f32.mrb[2].mxu0 }
 0x112   :  { %311 = vtanh.f32 %v112_v15  ;;  %v274_v18 = vpop.f32.mrb[3].mxu0 }
 0x11c   :  { %v312_v19 = vpop.eup %311 }
 0x11d   :  { %v118_v20 = vpack.c.bf16 %v312_v19, %v312_v19 }
 0x11f   :  { %292 = vmatmul.mubr.bf16.vlgmr.msra.gmra.mrb[0].mxu1 %v118_v20 }
 0x1f2   :  { %v224_v22 = vpop.f32.mrb[0].mxu1 }
 0x1f3   :  { %v225_v23 = vadd.f32 %v249_v21, %v224_v22  ;;  %v293_v24 = vpop.f32.mrb[1].mxu1 }
 0x1f4   :  { %v227_v25 = vpop.f32.mrb[2].mxu1 }
 0x1f5   :  { %230 = vst [vmem:[#allocation8] sm:$0x3] %v225_v23  ;;  %v294_v26 = vpop.f32.mrb[3].mxu1 }
 0x1f6   :  { %390 = shalt.err (!%p387_p0)
}
 0x1f7   :  { %s391_s4 = scalar_lea.hbm %s504_s5, 32 }
 0x1f8   :  { %p392_p1 = scmp.ne.s32.totalorder %s504_s5, %s391_s4  ;;  %p395_p2 = scmp.lt.u32.totalorder %s391_s4, %s504_s5 }
 0x1fa   :  { %p397_p3 = pnand %p395_p2, %p392_p1 }
 0x1fc   :  { %400 = shalt.err (!%p397_p3)
}
 0x1fd   :  { %240 = dma.vmem_to_hbm [thread:$0]  %s238_s8, 32, %s504_s5, [#allocation4]  }
 0x1fe   :  { %405 = dma.done.wait [#allocation4], 32  }
 0x1ff   :  { %406 = vsyncadd [#allocation4], 4294967264 }
 0x200   :  { %244 = vsyncpa [#allocation3], 1 }
 0x201   :  { %245 = vsyncpa [#allocation6], 1 }
 0x202   :  { %246 = vsyncpa [#allocation4], 1 }

</bundles_post_ra>
